<compile_context>
chip_gen: v7x
topology: tpu7x:2x2x1
jax: 0.10.0
libtpu: 0.0.40
codegen_flags: <defaults>
</compile_context>

<pallas_src>
import math
import numpy as np
import jax
import jax.numpy as jnp
from jax.experimental import pallas as pl
from jax.experimental.pallas import tpu as pltpu


def _decoder_kernel(mw_ref, mask_ref, w_ref, y_ref):
    # mw_ref, mask_ref: (1, N, Kt)   w_ref: (L, N)   y_ref: (1, L, Kt)
    # Elementwise mask application in the native [N, Kt] layout (K on lanes, VPU).
    x = mw_ref[0] * mask_ref[0]                                       # (N, Kt)

    # Basis-signal projection on the MXU: y[l, k] = sum_n W[l, n] * x[n, k].
    # f32 operands -> HIGHEST to match the PyTorch f32 Linear bit-for-bit;
    # bf16 operands -> native bf16 MXU passes with f32 accumulation.
    prec = (jax.lax.Precision.HIGHEST if w_ref.dtype == jnp.float32
            else jax.lax.Precision.DEFAULT)
    y = jnp.dot(w_ref[...], x,
                preferred_element_type=jnp.float32,
                precision=prec)                                       # (L, Kt)

    y_ref[0] = y.astype(y_ref.dtype)


def _pick_k_tile(K, N, itemsize, B):
    """Lane-dense K tile sized to keep double-buffered inputs well inside VMEM."""
    if K <= 128:
        return K                      # single full-width block (toy / short seq)
    # ~2 MiB per (N, Kt) input block => 2 inputs x 2 buffers ~ 8 MiB of input
    # buffering: fits the default scoped-VMEM limit on v5e/v6e and v7x's 64 MiB.
    budget_bytes = 2 * 1024 * 1024
    kt = (budget_bytes // (N * itemsize)) // 128 * 128
    kt = int(max(128, min(kt, 1024)))
    kt = min(kt, (K // 128) * 128)    # never wider than the array (floor to 128)
    if B == 1 and K >= 256:
        # Keep >= 2 K tiles so both v7x TensorCores get work at batch 1.
        kt = min(kt, max(128, (K // 2) // 128 * 128))
    return kt


def decoder_forward(mixture_w, est_mask, basis_w, L, *,
                    activation_dtype=None, k_tile=None):
    """mixture_w, est_mask: [B, N, K] (native PyTorch layout). basis_w: [L, N].

    activation_dtype: optional bf16 operand path (halves HBM traffic; the dot
    still accumulates in f32).  k_tile: override the K-tile size (multiple of
    128 recommended for large K).
    """
    # TODO(synk): overlap_and_add is implemented for even L (hop = L // 2); odd L
    # would need the general gcd-based subframe scatter.
    assert L % 2 == 0, "kernel supports even L (frame_step = L // 2)"
    B, N, K = mixture_w.shape
    assert basis_w.shape == (L, N)
    hop = L // 2
    T = (K - 1) * hop + L            # == (K + 1) * hop

    dt = jnp.float32 if activation_dtype is None else activation_dtype
    itemsize = jnp.dtype(dt).itemsize
    mw = mixture_w.astype(dt)
    mk = est_mask.astype(dt)
    w = basis_w.astype(dt)

    Kt = _pick_k_tile(K, N, itemsize, B) if k_tile is None else int(k_tile)
    num_kt = pl.cdiv(K, Kt)

    cost = pl.CostEstimate(
        flops=2 * B * K * N * L + B * N * K,
        transcendentals=0,
        bytes_accessed=itemsize * (2 * B * N * K + L * N) + 4 * B * L * K,
    )

    # Kernel emits the raw projection y = W @ (mw*mask), lane-dense per K tile.
    y = pl.pallas_call(
        _decoder_kernel,
        out_shape=jax.ShapeDtypeStruct((B, L, K), jnp.float32),
        grid=(B, num_kt),
        in_specs=[
            pl.BlockSpec((1, N, Kt), lambda b, kt: (b, 0, kt)),
            pl.BlockSpec((1, N, Kt), lambda b, kt: (b, 0, kt)),
            # Constant block index: W stays resident in VMEM across the grid.
            # (Second pipeline buffer for W is only L*N*itemsize — negligible.)
            pl.BlockSpec((L, N), lambda b, kt: (0, 0)),
        ],
        out_specs=pl.BlockSpec((1, L, Kt), lambda b, kt: (b, 0, kt)),
        compiler_params=pltpu.CompilerParams(
            dimension_semantics=("parallel", "parallel")),
        cost_estimate=cost,
    )(mw, mk, w)

    # Overlap-and-add (frame_step = hop) + layout fixup on the SMALL projected
    # output only (L rows vs N rows of activations -> a few % of HBM traffic):
    #   out_sub[:, :, j] = y[:, :hop, j] + y[:, hop:, j-1]
    first = y[:, :hop, :]                                             # (B, hop, K)
    second = y[:, hop:, :]                                            # (B, hop, K)
    pad = jnp.zeros((B, hop, 1), y.dtype)
    out_sub = (jnp.concatenate([first, pad], axis=2) +
               jnp.concatenate([pad, second], axis=2))                # (B, hop, K+1)
    # (B, hop, K+1) -> (B, K+1, hop) -> (B, T): subframe-major time axis.
    return jnp.transpose(out_sub, (0, 2, 1)).reshape(B, T)


def _reference_forward(mixture_w, est_mask, basis_w, L):
    """Pure-JAX reference mirroring the PyTorch module (for verification)."""
    est = jnp.transpose(mixture_w * est_mask, (0, 2, 1))              # [B, K, N]
    est = jnp.einsum('bkn,ln->bkl', est, basis_w,
                     precision=jax.lax.Precision.HIGHEST)             # [B, K, L]
    B, K, _ = est.shape
    hop = L // 2
    T = (K - 1) * hop + L
    frames = est.reshape(B, K, 2, hop)
    out = jnp.zeros((B, K + 1, hop), est.dtype)
    out = out.at[:, :K, :].add(frames[:, :, 0, :])
    out = out.at[:, 1:, :].add(frames[:, :, 1, :])
    return out.reshape(B, T)


if __name__ == "__main__":
    # Small shapes consistent with the module: B batches, N basis channels,
    # K encoder frames, window length L.
    B, N, K, L = 2, 32, 256, 16

    key = jax.random.PRNGKey(0)
    k1, k2, k3 = jax.random.split(key, 3)

    mixture_w = jax.random.normal(k1, (B, N, K), dtype=jnp.float32)
    est_mask = jax.nn.sigmoid(jax.random.normal(k2, (B, N, K), dtype=jnp.float32))

    # nn.Linear(N, L, bias=False) weight: shape [L, N], kaiming-uniform-like init.
    bound = 1.0 / math.sqrt(N)
    basis_w = jax.random.uniform(k3, (L, N), minval=-bound, maxval=bound,
                                 dtype=jnp.float32)

    ref = _reference_forward(mixture_w, est_mask, basis_w, L)

    # 1) f32 path, multi-tile grid (Kt=128 -> 2 lane-dense K tiles per batch).
    out = jax.block_until_ready(
        decoder_forward(mixture_w, est_mask, basis_w, L, k_tile=128))
    np.testing.assert_allclose(np.asarray(out), np.asarray(ref),
                               rtol=1e-5, atol=1e-5)
    assert out.shape == (B, (K - 1) * (L // 2) + L)

    # 2) Short-sequence path (K < 128: single full-width block).
    mw_s, mk_s = mixture_w[:, :, :8], est_mask[:, :, :8]
    out_s = jax.block_until_ready(decoder_forward(mw_s, mk_s, basis_w, L))
    ref_s = _reference_forward(mw_s, mk_s, basis_w, L)
    np.testing.assert_allclose(np.asarray(out_s), np.asarray(ref_s),
                               rtol=1e-5, atol=1e-5)

    # 3) bf16 operand path (halves HBM traffic for this HBM-bound kernel).
    out_bf16 = jax.block_until_ready(
        decoder_forward(mixture_w, est_mask, basis_w, L,
                        activation_dtype=jnp.bfloat16))
    np.testing.assert_allclose(np.asarray(out_bf16), np.asarray(ref),
                               rtol=1e-1, atol=1e-1)

    print("KERNEL_OK")
</pallas_src>

<mosaic_0001>
module attributes {stable_mosaic.version = 11 : i64} {
  func.func @_decoder_kernel(%arg0: i32, %arg1: i32, %arg2: memref<1x32x128xf32, #tpu.memory_space<vmem>>, %arg3: memref<1x32x128xf32, #tpu.memory_space<vmem>>, %arg4: memref<16x32xf32, #tpu.memory_space<vmem>>, %arg5: memref<1x16x128xf32, #tpu.memory_space<vmem>>) attributes {dimension_semantics = [#tpu.dimension_semantics<parallel>, #tpu.dimension_semantics<parallel>], iteration_bounds = array<i64: 2, 2>, scalar_prefetch = 0 : i64, scratch_operands = 0 : i64, tpu.core_type = #tpu.core_type<tc>, window_params = [{transform_indices = @transform_0, window_bounds = array<i64: 1, 32, 128>}, {transform_indices = @transform_1, window_bounds = array<i64: 1, 32, 128>}, {pipeline_mode = #tpu.pipeline_mode<synchronous>, transform_indices = @transform_2, window_bounds = array<i64: 16, 32>}, {transform_indices = @transform_3, window_bounds = array<i64: 1, 16, 128>}]} {
    %c0 = arith.constant 0 : index
    %c0_0 = arith.constant 0 : index
    %c0_1 = arith.constant 0 : index
    %0 = vector.load %arg2[%c0, %c0_0, %c0_1] : memref<1x32x128xf32, #tpu.memory_space<vmem>>, vector<1x32x128xf32>
    %1 = vector.shape_cast %0 : vector<1x32x128xf32> to vector<32x128xf32>
    %c0_2 = arith.constant 0 : index
    %c0_3 = arith.constant 0 : index
    %c0_4 = arith.constant 0 : index
    %2 = vector.load %arg3[%c0_2, %c0_3, %c0_4] : memref<1x32x128xf32, #tpu.memory_space<vmem>>, vector<1x32x128xf32>
    %3 = vector.shape_cast %2 : vector<1x32x128xf32> to vector<32x128xf32>
    %4 = arith.mulf %1, %3 : vector<32x128xf32>
    %c0_5 = arith.constant 0 : index
    %c0_6 = arith.constant 0 : index
    %5 = vector.load %arg4[%c0_5, %c0_6] : memref<16x32xf32, #tpu.memory_space<vmem>>, vector<16x32xf32>
    %cst = arith.constant dense<0.000000e+00> : vector<16x128xf32>
    %6 = tpu.matmul %5, %4, %cst {dimension_numbers = #tpu.dot_dimension_numbers<[1], [0], [0], [1], [0, 0, 1, 1], [], []>, precision = #tpu.contract_precision<fp32>} : vector<16x32xf32>, vector<32x128xf32>, vector<16x128xf32> -> vector<16x128xf32>
    %c0_7 = arith.constant 0 : index
    %c0_8 = arith.constant 0 : index
    %c0_9 = arith.constant 0 : index
    %7 = vector.load %arg5[%c0_7, %c0_8, %c0_9] : memref<1x16x128xf32, #tpu.memory_space<vmem>>, vector<1x16x128xf32>
    %8 = vector.shape_cast %7 : vector<1x16x128xf32> to vector<16x128xf32>
    %9 = vector.shape_cast %6 : vector<16x128xf32> to vector<1x16x128xf32>
    tpu.vector_store %arg5[%c0_7, %c0_8, %c0_9], %9 {strides = array<i32>} : memref<1x16x128xf32, #tpu.memory_space<vmem>>, vector<1x16x128xf32>,
    return
  }
  func.func @transform_0(%arg0: i32, %arg1: i32) -> (i32, i32, i32) {
    %c0_i32 = arith.constant 0 : i32
    %c0_i32_0 = arith.constant 0 : i32
    return %arg0, %c0_i32, %arg1 : i32, i32, i32
  }
  func.func @transform_1(%arg0: i32, %arg1: i32) -> (i32, i32, i32) {
    %c0_i32 = arith.constant 0 : i32
    %c0_i32_0 = arith.constant 0 : i32
    return %arg0, %c0_i32, %arg1 : i32, i32, i32
  }
  func.func @transform_2(%arg0: i32, %arg1: i32) -> (i32, i32) {
    %c0_i32 = arith.constant 0 : i32
    %c0_i32_0 = arith.constant 0 : i32
    %c0_i32_1 = arith.constant 0 : i32
    return %c0_i32, %c0_i32_0 : i32, i32
  }
  func.func @transform_3(%arg0: i32, %arg1: i32) -> (i32, i32, i32) {
    %c0_i32 = arith.constant 0 : i32
    %c0_i32_0 = arith.constant 0 : i32
    return %arg0, %c0_i32, %arg1 : i32, i32, i32
  }
}

</mosaic_0001>

<bundles_post_ra>
// kernel: tpu_custom_call.1
= control target key start
LH: loop header
LB: loop body
LE: loop exit
PB: predicated region body
PF: predicated region fallthrough
CT: control target
= control target key end

     0   :  { %s1772_s0 = inlined_call_operand.hbm [shape: f32[2,32,256], index: 0, kind: input, shape index: {}]   ;;  %s1773_s1 = inlined_call_operand.hbm [shape: f32[2,32,256], index: 1, kind: input, shape index: {}]   ;;  %s1774_s2 = inlined_call_operand.hbm [shape: f32[16,32], index: 2, kind: input, shape index: {}]   ;;  %s1775_s3 = inlined_call_operand.hbm [shape: f32[2,16,256], index: 3, kind: output, shape index: {}]  }
   0x1   :  { %1791 = sst [smem:[#allocation18_spill]] %s1772_s0 }
   0x2   :  { %1792 = sst [smem:[#allocation19_spill]] %s1774_s2 }
   0x3   :  { %8 = vsyncpa [#allocation3], 0 }
   0x4   :  { %10 = vsyncpa [#allocation3 + $0x1], 0 }
   0x5   :  { %11 = vsyncpa [#allocation6], 0 }
   0x6   :  { %13 = vsyncpa [#allocation6 + $0x1], 0 }
   0x7   :  { %14 = vsyncpa [#allocation4], 0 }
   0x8   :  { %16 = vsyncpa [#allocation4 + $0x1], 0  ;;  %s1458_s12 = smov 0   ;;  %s1460_s13 = smov 0  }
   0x9   :  { %s1462_s14 = smov 0   ;;  %s1464_s15 = smov 0  }
   0xa   :  { %s1466_s16 = smov 0   ;;  %s1468_s17 = smov 0  }
   0xb   :  { %s1470_s18 = smov 0   ;;  %s1472_s19 = smov 0  }
   0xc LB: > { %1793 = sst [smem:[#allocation13_spill]] %s1418_s17  ;;  %s1499_s20 = sadd.s32 4294967295, %s1426_s19   ;;  %s1426_s19 = sphi %s1472_s19, %s22_s19   ;;  %s1422_s18 = sphi %s1470_s18, %s1822_s18   ;;  %s1418_s17 = sphi %s1468_s17, %s1821_s17   ;;  %s1414_s16 = sphi %s1466_s16, %s1820_s16   ;;  %s1410_s15 = sphi %s1464_s15, %s1819_s15   ;;  %s1406_s14 = sphi %s1462_s14, %s1825_s14   ;;  %s1402_s13 = sphi %s1460_s13, %s1824_s13   ;;  %s1398_s12 = sphi %s1458_s12, %s1823_s12  }
   0xd   : > { %1794 = sst [smem:[#allocation14_spill]] %s1422_s18  ;;  %s952_s21 = sadd.s32 4294967294, %s1426_s19  }
   0xe   : > { %p50_p0 = scmp.ne.s32.totalorder %s1406_s14, %s1402_s13  ;;  %p51_p1 = scmp.eq.s32.totalorder %s1426_s19, 0 }
   0xf   : > { %p56_p2 = scmp.ne.s32.totalorder %s1402_s13, %s1398_s12  ;;  %p1776_p3 = scmp.eq.s32.totalorder %s1499_s20, 0 }
  0x10   : > { %p131_p4 = scmp.eq.s32.totalorder %s1499_s20, 3  ;;  %p1510_p5 = por %p51_p1, %p50_p0 }
  0x11   : > { %p137_p6 = scmp.eq.s32.totalorder %s952_s21, 3  ;;  %p1516_p7 = por %p1776_p3, %p56_p2 }
  0x12   : > { %p1520_p8 = por %p131_p4, %p50_p0  ;;  %p953_p10 = scmp.ge.s32.totalorder %s1426_s19, 1 }
  0x13   : > { %s1796_s24 = scalar_select %p1516_p7, 1, 0 }
  0x14   : > { %s1797_s25 = scalar_select %p1520_p8, 1, 0 }
  0x15   : > { %p1524_p9 = por %p137_p6, %p56_p2  ;;  %p144_p11 = scmp.lt.s32.totalorder %s1426_s19, 5 }
  0x16   : > { %s1428_s28 = smov [#allocation7]   ;;  %p1158_p0 = scmp.lt.s32.totalorder %s1426_s19, 4 }
  0x17   : > { %s1798_s26 = scalar_select %p1524_p9, 1, 0 }
  0x18   : > { %p1530_p12 = pnand %p953_p10, %p144_p11  ;;  %s156_s29 = sshll.u32 %s1428_s28, 4  ;;  %s157_s29 = int_to_ptr.vmem [resolvable:$true] %s156_s29 }
  0x19   : > { %1799 = sst [smem:[#allocation15_spill]] %s1798_s26  ;;  %p1545_p2 = pnand %p1158_p0, %p1510_p5 }
  0x1a   : > { %s1800_s27 = scalar_select %p1530_p12, 1, 0 }
  0x1b   : > { %p1142_p13 = pneg %p1530_p12  ;;  %s1803_s2 = sld [smem:[#allocation19_spill]] }
  0x1c   : > { %s1802_s4 = scalar_select %p1545_p2, 1, 0 }
  0x1d   : > { %p1539_p1 = pnand %p1142_p13, %p1776_p3 }
  0x1f   : > { %p1234_p6 = pneg %p1539_p1 }
  0x21   : > { %s1232_s7 = scalar_lea.hbm %s1803_s2, 256 }
  0x22   : > { %p1233_p4 = scmp.ne.s32.totalorder %s1803_s2, %s1232_s7  ;;  %p1239_p13 = scmp.lt.u32.totalorder %s1232_s7, %s1803_s2 }
  0x24   : > { %p1235_p10 = pnand %p1234_p6, %p1233_p4 }
  0x26   : > { %p1236_p11 = pneg %p1235_p10 }
  0x28   : > { %p1241_p5 = pnand %p1239_p13, %p1236_p11 }
  0x2a   : > { %1244 = shalt.err (!%p1241_p5)
}
  0x2b   : > { %s1245_s21 = scalar_lea.vmem %s157_s29, 256  ;;  %p1253_p8 = scmp.lt.s32.totalorder %s157_s29, %s157_s29 }
  0x2c   : > { %p1246_p0 = scmp.ne.s32.totalorder %s157_s29, %s1245_s21  ;;  %p1254_p7 = scmp.lt.s32.totalorder %s1245_s21, %s1245_s21 }
  0x2e   : > { %p1248_p3 = pnand %p1246_p0, %p1234_p6  ;;  %p1255_p12 = por %p1254_p7, %p1253_p8 }
  0x30   : > { %p1249_p9 = pneg %p1248_p3 }
  0x32   : > { %p1256_p2 = pnand %p1255_p12, %p1249_p9 }
  0x34   : > { %1259 = shalt.err (!%p1256_p2)
}
  0x35   : > { %s1781_s23 = smov 128   ;;  %s1783_s28 = smov 8  }
  0x36   : > { %1145 = dma.hbm_to_vmem [thread:$0]  (!%p1539_p1), %s1803_s2, 256, %s157_s29, [#allocation6], %s1781_s23, %s1781_s23, %s1783_s28  }
  0x37   : > { %s31_s7 = sadd.s32 1, %s1418_s17  ;;  %s34_s8 = sadd.s32 1, %s1422_s18 }
  0x38   : > { %p32_p3 = scmp.ge.s32.totalorder %s31_s7, 2  ;;  %s170_s9 = sand.u32 1, %s1406_s14  }
  0x39   : > { %s957_s10 = sshll.u32 %s1422_s18, 3  ;;  %s1577_s30 = sshll.u32 %s170_s9, 5 }
  0x3a   : > { %s1827_s7 = smov (%p32_p3, %s31_s7), 0  ;;  %s1829_s8 = smov (!%p32_p3, %s34_s8), %s1422_s18 }
  0x3b   : > { %1804 = sst [smem:[#allocation16_spill]] %s1827_s7  ;;  %s39_s11 = ssub.s32 %s1418_s17, %s1827_s7 }
  0x3c   : > { %p36_p7 = scmp.ge.s32.totalorder %s1829_s8, 2  ;;  %s1580_s21 = sadd.s32 %s1418_s17, %s957_s10 }
  0x3d   : > { %s1786_s29 = sshll.u32 %s1580_s21, 7  ;;  %s174_s5 = scalar_lea.vmem [#allocation2], %s1577_s30 }
  0x3e   : > { %s1831_s8 = smov (%p36_p7, %s1829_s8), 0  ;;  %s182_s6 = sshll.u32 %s174_s5, 4  ;;  %s1597_s6 = int_to_ptr.vmem [resolvable:$true] %s182_s6 }
  0x3f   : > { %1805 = sst [smem:[#allocation17_spill]] %s1831_s8  ;;  %s38_s22 = ssub.s32 %s1422_s18, %s1831_s8 }
  0x40   : > { %s1806_s0 = sld [smem:[#allocation18_spill]]  ;;  %s1595_s10 = sor.u32 %s39_s11, %s38_s22 }
  0x41   : > { %p41_p8 = scmp.eq.s32.totalorder %s1595_s10, 0  ;;  %s1600_s7 = scalar_lea.sflag [#allocation3], %s170_s9 }
  0x42   : > { %p1807_p12 = scmp.ne.s32.totalorder %s1802_s4, 0 }
  0x44   : > { %p1262_p1 = pneg %p1807_p12 }
  0x46   : > { %s1593_s2 = scalar_lea.hbm %s1806_s0, %s1786_s29  ;;  %s1265_s29 = scalar_lea.hbm %s1806_s0, 2048 }
  0x47   : > { %s1260_s5 = scalar_lea.hbm %s1593_s2, 512  ;;  %p1266_p6 = scmp.lt.u32.totalorder %s1593_s2, %s1806_s0 }
  0x48   : > { %p1261_p9 = scmp.ne.s32.totalorder %s1593_s2, %s1260_s5  ;;  %p1267_p10 = scmp.lt.u32.totalorder %s1265_s29, %s1260_s5 }
  0x49   : > { %p1269_p13 = scmp.lt.u32.totalorder %s1260_s5, %s1593_s2 }
  0x4a   : > { %p1263_p2 = pnand %p1262_p1, %p1261_p9  ;;  %p1268_p11 = por %p1267_p10, %p1266_p6 }
  0x4c   : > { %p1264_p4 = pneg %p1263_p2  ;;  %p1270_p5 = por %p1269_p13, %p1268_p11 }
  0x4e   : > { %p1271_p0 = pnand %p1270_p5, %p1264_p4 }
  0x50   : > { %1274 = shalt.err (!%p1271_p0)
}
  0x51   : > { %s1275_s9 = scalar_lea.vmem %s1597_s6, 512  ;;  %s1431_s23 = smov [#allocation2]  }
  0x52   : > { %p1276_p3 = scmp.ne.s32.totalorder %s1597_s6, %s1275_s9  ;;  %s1280_s28 = sshll.u32 %s1431_s23, 4  ;;  %s1281_s28 = int_to_ptr.vmem [resolvable:$false] %s1280_s28 }
  0x53   : > { %s1282_s22 = scalar_lea.vmem %s1281_s28, 1024  ;;  %p1283_p2 = scmp.lt.s32.totalorder %s1597_s6, %s1281_s28 }
  0x54   : > { %p1278_p7 = pnand %p1276_p3, %p1262_p1  ;;  %p1284_p6 = scmp.lt.s32.totalorder %s1282_s22, %s1275_s9 }
  0x56   : > { %p1279_p9 = pneg %p1278_p7  ;;  %p1285_p10 = por %p1284_p6, %p1283_p2 }
  0x58   : > { %p1286_p11 = pnand %p1285_p10, %p1279_p9 }
  0x5a   : > { %1289 = shalt.err (!%p1286_p11)
}
  0x5b   : > { %s1432_s29 = smov 256   ;;  %s1808_s5 = smov 8  }
  0x5c   : > { %s1809_s11 = smov 128   ;;  %s1810_s9 = sadd.s32 1, %s1406_s14 }
  0x5d   : > { %1149 = dma.hbm_to_vmem [thread:$0]  (!%p1807_p12), %s1593_s2, 512, %s1597_s6, %s1600_s7, %s1432_s29, %s1809_s11, %s1808_s5  }
  0x5e   : > { %s1636_s23 = scalar_select %p41_p8, %s1406_s14, %s1810_s9  }
  0x5f   : > { %s1811_s28 = sshll.u32 %s1580_s21, 7  ;;  %s196_s18 = scalar_lea.vmem [#allocation5], %s1577_s30 }
  0x60   : > { %s1643_s8 = scalar_lea.hbm %s1773_s1, %s1811_s28  ;;  %s204_s17 = sshll.u32 %s196_s18, 4  ;;  %s1647_s17 = int_to_ptr.vmem [resolvable:$true] %s204_s17 }
  0x61   : > { %s192_s26 = sand.u32 1, %s1426_s19   ;;  %s1290_s7 = scalar_lea.hbm %s1643_s8, 512 }
  0x62   : > { %s1649_s2 = scalar_lea.sflag [#allocation6], %s192_s26  ;;  %p1291_p8 = scmp.ne.s32.totalorder %s1643_s8, %s1290_s7 }
  0x63   : > { %s1295_s6 = scalar_lea.hbm %s1773_s1, 2048  ;;  %p1296_p5 = scmp.lt.u32.totalorder %s1643_s8, %s1773_s1 }
  0x64   : > { %p1293_p4 = pnand %p1291_p8, %p1262_p1  ;;  %p1297_p0 = scmp.lt.u32.totalorder %s1295_s6, %s1290_s7 }
  0x65   : > { %p1299_p7 = scmp.lt.u32.totalorder %s1290_s7, %s1643_s8 }
  0x66   : > { %p1294_p13 = pneg %p1293_p4  ;;  %p1298_p3 = por %p1297_p0, %p1296_p5 }
  0x68   : > { %p1300_p9 = por %p1299_p7, %p1298_p3 }
  0x6a   : > { %p1301_p2 = pnand %p1300_p9, %p1294_p13 }
  0x6c   : > { %1304 = shalt.err (!%p1301_p2)
}
  0x6d   : > { %s1305_s18 = scalar_lea.vmem %s1647_s17, 512  ;;  %s1433_s26 = smov [#allocation5]  }
  0x6e   : > { %p1306_p6 = scmp.ne.s32.totalorder %s1647_s17, %s1305_s18  ;;  %s1310_s30 = sshll.u32 %s1433_s26, 4  ;;  %s1311_s30 = int_to_ptr.vmem [resolvable:$false] %s1310_s30 }
  0x6f   : > { %s1312_s28 = scalar_lea.vmem %s1311_s30, 1024  ;;  %p1313_p8 = scmp.lt.s32.totalorder %s1647_s17, %s1311_s30 }
  0x70   : > { %p1308_p10 = pnand %p1306_p6, %p1262_p1  ;;  %p1314_p4 = scmp.lt.s32.totalorder %s1312_s28, %s1305_s18 }
  0x72   : > { %p1309_p11 = pneg %p1308_p10  ;;  %p1315_p5 = por %p1314_p4, %p1313_p8 }
  0x74   : > { %p1316_p0 = pnand %p1315_p5, %p1309_p11 }
  0x76   : > { %1319 = shalt.err (!%p1316_p0)
}
  0x77   : > { %1152 = dma.hbm_to_vmem [thread:$0]  (!%p1807_p12), %s1643_s8, 512, %s1647_s17, %s1649_s2, %s1432_s29, %s1809_s11, %s1808_s5  }
  0x78   : > { %p1812_p1 = scmp.ne.s32.totalorder %s1800_s27, 0 }
  0x79   : > { %s1681_s22 = sand.u32 (!%p1812_p1), 1, %s1402_s13   ;;  %p1813_p13 = scmp.ne.s32.totalorder (!%p1812_p1), %s1796_s24, 0 }
  0x7a   : > { %216 = sbr.rel (%p1812_p1) target bundleno = 400 (0x190), region = 32  ;;  %s963_s7 = sshll.u32 (!%p1812_p1), %s1681_s22, 5 }
  0x7b   : > { %s219_s0 = scalar_lea.sflag (!%p1812_p1), [#allocation3], %s1681_s22  ;;  %s222_s21 = scalar_lea.vmem (!%p1812_p1), [#allocation2], %s963_s7 }
  0x81   : > { %1381 = dma.done.wait (%p1813_p13), %s219_s0, 512  }
  0x82   : > { %1383 = vsyncadd (%p1813_p13), %s219_s0, 4294966784  ;;  %s227_s17 = sand.u32 1, %s1499_s20   ;;  %s231_s27 = scalar_lea.vmem [#allocation5], %s963_s7 }
  0x83   : > { %s228_s4 = scalar_lea.sflag [#allocation6], %s227_s17 }
  0x84   : > { %1385 = dma.done.wait (%p1813_p13), %s228_s4, 512  }
  0x85   : > { %1387 = vsyncadd (%p1813_p13), %s228_s4, 4294966784  ;;  %p1814_p12 = scmp.eq.s32.totalorder %s1499_s20, 0 }
  0x87   : > { %1389 = dma.done.wait (%p1814_p12), [#allocation6], 256   ;;  %p1815_p3 = pmov %p1814_p12 }
  0x88   : > { %v263_v0 = vld [vmem:[%s222_s21] sm:$0xff]  ;;  %v264_v1 = vld [vmem:[%s222_s21 + $0x8] sm:$0xff]  ;;  %vm277_vm0 = vcmask 261120   ;;  %v265_v5 = vld [vmem:[%s222_s21 + $0x10] sm:$0xff]  ;;  %s966_s20 = sshll.u32 %s1681_s22, 4  ;;  %s968_s24 = sshll.u32 %s1414_s16, 2 }
  0x89   : > { %1391 = vsyncadd (%p1815_p3), [#allocation6], 4294967040  ;;  %v267_v2 = vld [vmem:[%s231_s27] sm:$0xff]  ;;  %v268_v3 = vld [vmem:[%s231_s27 + $0x8] sm:$0xff]  ;;  %s826_s8 = sadd.s32 %s1410_s15, %s968_s24  ;;  %s262_s29 = scalar_lea.vmem [#allocation8], %s966_s20 }
  0x8a   : > { %v271_v4 = vmul.f32 %v267_v2, %v263_v0  ;;  %v266_v6 = vld [vmem:[%s222_s21 + $0x18] sm:$0xff]  ;;  %v272_v7 = vmul.f32 %v268_v3, %v264_v1  ;;  %v269_v8 = vld [vmem:[%s231_s27 + $0x10] sm:$0xff]  ;;  %v275_v10 = vld [vmem:[#allocation7] sm:$0xff]  ;;  %s829_s5 = sshll.u32 %s262_s29, 4  ;;  %s969_s11 = sshll.u32 %s826_s8, 7  ;;  %s1713_s5 = int_to_ptr.vmem [resolvable:$true] %s829_s5 }
  0x8b   : > { %v270_v9 = vld [vmem:[%s231_s27 + $0x18] sm:$0xff]  ;;  %v273_v12 = vmul.f32 %v269_v8, %v265_v5  ;;  %v276_v14 = vld [vmem:[#allocation7 + $0x8] sm:$0xff]  ;;  %v279_v15 = vsel %vm277_vm0, %v275_v10, 0  ;;  %s1718_s10 = scalar_lea.hbm %s1775_s3, %s969_s11  ;;  %s815_s15 = scalar_lea.sflag [#allocation4], %s1681_s22 }
  0x8c   : > { %v285_v11 = vand.u32 4294901760, %v271_v4  ;;  %v274_v13 = vmul.f32 %v270_v9, %v266_v6  ;;  %v288_v16 = vand.u32 4294901760, %v272_v7  ;;  %v282_v17 = vsel %vm277_vm0, %v276_v14, 0  ;;  %s1320_s16 = scalar_lea.vmem %s1713_s5, 256  ;;  %p1816_p9 = scmp.ne.s32.totalorder %s1797_s25, 0 }
  0x8d   : > { %v1698_v18 = vand.u32 4294901760, %v279_v15  ;;  %v291_v19 = vand.u32 4294901760, %v273_v12  ;;  %v1700_v21 = vand.u32 4294901760, %v282_v17  ;;  %p1321_p7 = scmp.ne.s32.totalorder %s1713_s5, %s1320_s16  ;;  %s1434_s9 = smov [#allocation8]  }
  0x8e   : > { %v294_v20 = vand.u32 4294901760, %v274_v13  ;;  %v375_v22 = vsub.f32 %v271_v4, %v285_v11  ;;  %v1074_v23 = vpack.c.bf16 %v288_v16, %v285_v11  ;;  %v382_v25 = vsub.f32 %v272_v7, %v288_v16  ;;  %s1324_s18 = sshll.u32 %s1434_s9, 4  ;;  %s1325_s18 = int_to_ptr.vmem [resolvable:$false] %s1324_s18 }
  0x8f   : > { %v354_v24 = vsub.f32 %v279_v15, %v1698_v18  ;;  %v364_v27 = vsub.f32 %v282_v17, %v1700_v21  ;;  %v389_v29 = vsub.f32 %v273_v12, %v291_v19  ;;  %p1322_p2 = pnand %p1321_p7, %p1816_p9  ;;  %s1326_s26 = scalar_lea.vmem %s1325_s18, 512 }
  0x90   : > { %v1078_v26 = vpack.c.bf16 %v294_v20, %v291_v19  ;;  %v376_v28 = vand.u32 4294901760, %v375_v22  ;;  %1075 = vmatprep.subr.bf16.mxu1 %v1074_v23  ;;  %1099 = vmatprep.subr.bf16.mxu0 %v1074_v23  ;;  %v383_v31 = vand.u32 4294901760, %v382_v25  ;;  %v396_v32 = vsub.f32 %v274_v13, %v294_v20  ;;  %p1327_p10 = scmp.lt.s32.totalorder %s1713_s5, %s1325_s18  ;;  %p1328_p11 = scmp.lt.s32.totalorder %s1326_s26, %s1320_s16 }
  0x91   : > { %v355_v30 = vand.u32 4294901760, %v354_v24  ;;  %1077 = vmatpush3.bf16.msra.mxu1 %v1074_v23  ;;  %1101 = vmatpush3.bf16.msra.mxu0 %v1074_v23  ;;  %v365_v33 = vand.u32 4294901760, %v364_v27  ;;  %v390_v35 = vand.u32 4294901760, %v389_v29  ;;  %v1090_v52 = vpack.c.bf16 %v382_v25, %v375_v22  ;;  %p1323_p6 = pneg %p1322_p2 }
  0x92   : > { %v377_v34 = vsub.f32 %v375_v22, %v376_v28  ;;  %1079 = vmatprep.subr.bf16.mxu1 %v1078_v26  ;;  %1103 = vmatprep.subr.bf16.mxu0 %v1078_v26  ;;  %v384_v37 = vsub.f32 %v382_v25, %v383_v31  ;;  %v1106_v38 = vpack.c.bf16 %v383_v31, %v376_v28  ;;  %v397_v39 = vand.u32 4294901760, %v396_v32  ;;  %p1329_p8 = por %p1328_p11, %p1327_p10 }
  0x93   : > { %v356_v36 = vsub.f32 %v354_v24, %v355_v30  ;;  %1049 = vmatprep.mubr.f32.mxu0 %v355_v30  ;;  %v366_v40 = vsub.f32 %v364_v27, %v365_v33  ;;  %v391_v42 = vsub.f32 %v389_v29, %v390_v35  ;;  %v1094_v53 = vpack.c.bf16 %v396_v32, %v389_v29 }
  0x94   : > { %v378_v41 = vand.u32 4294901760, %v377_v34  ;;  %v385_v44 = vand.u32 4294901760, %v384_v37  ;;  %v398_v45 = vsub.f32 %v396_v32, %v397_v39  ;;  %v1110_v50 = vpack.c.bf16 %v397_v39, %v390_v35  ;;  %p1330_p4 = pnand %p1329_p8, %p1323_p6 }
  0x95   : > { %v357_v43 = vand.u32 4294901760, %v356_v36  ;;  %1081 = vmatpush3.bf16.msra.mxu1 %v1078_v26  ;;  %1105 = vmatpush3.bf16.msra.mxu0 %v1078_v26  ;;  %v367_v46 = vand.u32 4294901760, %v366_v40  ;;  %v392_v47 = vand.u32 4294901760, %v391_v42 }
  0x96   : > { %v1082_v48 = vpack.c.bf16 %v385_v44, %v378_v41  ;;  %1107 = vmatprep.subr.bf16.mxu0 %v1106_v38  ;;  %v399_v49 = vand.u32 4294901760, %v398_v45 }
  0x97   : > { %1016 = vmatprep.mubr.f32.mxu1 %v357_v43 }
  0x98   : > { %1017 = vmatmul.mubr.f32.vlgmr.msra.gmra.mrb[0].mxu1 %v367_v46  ;;  %1083 = vmatprep.subr.bf16.mxu1 %v1082_v48  ;;  %v1086_v51 = vpack.c.bf16 %v399_v49, %v392_v47 }
  0x99   : > { %1050 = vmatmul.mubr.f32.vlgmr.msra.gmra.mrb[0].mxu0 %v365_v33  ;;  %1085 = vmatpush3.bf16.msra.mxu1 %v1082_v48 }
  0x9a   : > { %1109 = vmatpush3.bf16.msra.mxu0 %v1106_v38  ;;  %1087 = vmatprep.subr.bf16.mxu1 %v1086_v51 }
  0x9b   : > { %1111 = vmatprep.subr.bf16.mxu0 %v1110_v50  ;;  %1027 = vmatprep.mubr.f32.mxu1 %v1698_v18 }
  0x9c   : > { %1060 = vmatprep.mubr.f32.mxu0 %v1698_v18 }
  0x9d   : > { %1089 = vmatpush3.bf16.msra.mxu1 %v1086_v51 }
  0x9e   : > { %1113 = vmatpush3.bf16.msra.mxu0 %v1110_v50  ;;  %1091 = vmatprep.subr.bf16.mxu1 %v1090_v52 }
  0x9f   : > { %1115 = vmatprep.subr.bf16.mxu0 %v1074_v23 }
  0xa0   : > { %1028 = vmatmul.mubr.f32.vlgmr.msra.gmra.mrb[0].mxu1 %v1700_v21 }
  0xa1   : > { %1061 = vmatmul.mubr.f32.vlgmr.msra.gmra.mrb[0].mxu0 %v1700_v21  ;;  %1093 = vmatpush3.bf16.msra.mxu1 %v1090_v52 }
  0xa2   : > { %1117 = vmatpush3.bf16.msra.mxu0 %v1074_v23  ;;  %1095 = vmatprep.subr.bf16.mxu1 %v1094_v53 }
  0xa3   : > { %1119 = vmatprep.subr.bf16.mxu0 %v1078_v26  ;;  %1038 = vmatprep.mubr.f32.mxu1 %v354_v24 }
  0xa4   : > { %1071 = vmatprep.mubr.f32.mxu0 %v1698_v18 }
  0xa5   : > { %1097 = vmatpush3.bf16.msra.mxu1 %v1094_v53 }
  0xa6   : > { %1121 = vmatpush3.bf16.msra.mxu0 %v1078_v26 }
  0xa8   : > { %1039 = vmatmul.mubr.f32.vlgmr.msra.gmra.mrb[0].mxu1 %v364_v27 }
  0xa9   : > { %1072 = vmatmul.mubr.f32.vlgmr.msra.gmra.mrb[0].mxu0 %v1700_v21 }
 0x17b   : > { %v1040_v54 = vpop.f32.mrb[0].mxu1 }
 0x17c   : > { %v1073_v55 = vpop.f32.mrb[0].mxu0  ;;  %v546_v56 = vpop.f32.mrb[1].mxu1 }
 0x17d   : > { %v1122_v57 = vadd.f32 %v1073_v55, %v1040_v54  ;;  %v802_v58 = vpop.f32.mrb[1].mxu0 }
 0x17e   : > { %v1123_v59 = vadd.f32 %v802_v58, %v546_v56 }
 0x17f   : > { %813 = vst [vmem:[%s262_s29 + $0x8] sm:$0xff] %v1122_v57 }
 0x180   : > { %812 = vst [vmem:[%s262_s29] sm:$0xff] %v1123_v59 }
 0x181   : > { %1333 = shalt.err (!%p1330_p4)
}
 0x182   : > { %s1334_s30 = scalar_lea.hbm %s1718_s10, 256  ;;  %s1338_s0 = scalar_lea.hbm %s1775_s3, 1024 }
 0x183   : > { %p1335_p5 = scmp.ne.s32.totalorder %s1718_s10, %s1334_s30  ;;  %p1339_p13 = scmp.lt.u32.totalorder %s1718_s10, %s1775_s3 }
 0x184   : > { %p1340_p12 = scmp.lt.u32.totalorder %s1338_s0, %s1334_s30  ;;  %p1342_p7 = scmp.lt.u32.totalorder %s1334_s30, %s1718_s10 }
 0x185   : > { %p1336_p0 = pnand %p1335_p5, %p1816_p9 }
 0x186   : > { %p1341_p3 = por %p1340_p12, %p1339_p13 }
 0x187   : > { %p1337_p1 = pneg %p1336_p0 }
 0x188   : > { %p1343_p2 = por %p1342_p7, %p1341_p3 }
 0x18a   : > { %p1344_p6 = pnand %p1343_p2, %p1337_p1 }
 0x18c   : > { %1347 = shalt.err (!%p1344_p6)
}
 0x18d   : > { %s1435_s4 = smov 128   ;;  %s1436_s27 = smov 256  }
 0x18e   : > { %s1437_s20 = smov 8  }
 0x18f   : > { %1140 = dma.vmem_to_hbm [thread:$0]  (%p1816_p9), %s1713_s5, 256, %s1718_s10, %s815_s15, %s1435_s4, %s1436_s27, %s1437_s20  }
 0x190 PF: > { %s1817_s24 = sld [smem:[#allocation15_spill]]  ;;  %p1160_p10 = scmp.ge.s32.totalorder %s1426_s19, 2 }
 0x191   : > { %s844_s8 = sand.u32 1, %s1398_s12  }
 0x192   : > { %s845_s29 = scalar_lea.sflag [#allocation4], %s844_s8 }
 0x196   : > { %p1818_p11 = scmp.ne.s32.totalorder %s1817_s24, 0 }
 0x198   : > { %p1154_p8 = pnand %p1160_p10, %p1818_p11 }
 0x19a   : > { %1393 = dma.done.wait (!%p1154_p8), %s845_s29, 256  }
 0x19b   : > { %1395 = vsyncadd (!%p1154_p8), %s845_s29, 4294967040  ;;  %s22_s19 = sadd.s32 1, %s1426_s19   ;;  %s1819_s15 = sld [smem:[#allocation13_spill]] }
 0x19c   : > { %p19_p4 = scmp.ge.s32.totalorder %s22_s19, 6   ;;  %s1820_s16 = sld [smem:[#allocation14_spill]] }
 0x19d   : > { %s1821_s17 = sld [smem:[#allocation16_spill]]  ;;  %s1822_s18 = sld [smem:[#allocation17_spill]] }
 0x19e   : > { %s1823_s12 = smov %s1402_s13  ;;  %s1824_s13 = smov %s1406_s14 }
 0x19f   : > { %s1825_s14 = smov %s1636_s23  ;;  %21 = sbr.rel (!%p19_p4) target bundleno = 12 (0xc), region = 94 }
 0x1a6   :  { %850 = vsyncpa [#allocation3], 1 }
 0x1a7   :  { %852 = vsyncpa [#allocation3 + $0x1], 1 }
 0x1a8   :  { %853 = vsyncpa [#allocation6], 1 }
 0x1a9   :  { %855 = vsyncpa [#allocation6 + $0x1], 1 }
 0x1aa   :  { %856 = vsyncpa [#allocation4], 1 }
 0x1ab   :  { %858 = vsyncpa [#allocation4 + $0x1], 1 }

</bundles_post_ra>
